<compile_context>
chip_gen: v5e
topology: v5e:2x2
jax: 0.10.0
libtpu: 0.0.40
codegen_flags: <defaults>
</compile_context>

<pallas_src>
import functools

import jax
import jax.numpy as jnp
import numpy as np
from jax.experimental import pallas as pl
from jax.experimental.pallas import tpu as pltpu

DEC_LANES = 128  # lane-padded width of the decision output (sliced to 2 outside)


# ----------------------------------------------------------------------------
# Lattice structure (reconstruction of generateFixedWeightMask_PredPrey):
# per-pixel degree-dependent weight w and 4-neighbour existence masks.
# ----------------------------------------------------------------------------
def _lattice_vectors(image_size):
    n = image_size * image_size
    r, c = np.divmod(np.arange(n), image_size)
    has_l = c > 0
    has_r = c < image_size - 1
    has_u = r > 0
    has_d = r < image_size - 1
    deg = has_l.astype(np.int32) + has_r + has_u + has_d
    w = np.full(n, 0.25, np.float32)
    w[deg == 3] = 0.34          # edgeMask
    w[deg == 2] = 0.5           # cornerMask
    return w, has_l, has_r, has_u, has_d


def build_params(image_size, hp):
    """Stencil coefficient rows (w folded with boundary masks) + bias, zero-padded
    to hp lanes so padding lanes never contribute."""
    n = image_size * image_size
    w, has_l, has_r, has_u, has_d = _lattice_vectors(image_size)

    def pad_row(v):
        out = np.zeros((1, hp), np.float32)
        out[0, :n] = v
        return jnp.asarray(out)

    return dict(
        wl=pad_row(w * has_l),                      # coeff applied to u[i-1]
        wr=pad_row(w * has_r),                      # coeff applied to u[i+1]
        wu=pad_row(w * has_u),                      # coeff applied to u[i-imageSize]
        wd=pad_row(w * has_d),                      # coeff applied to u[i+imageSize]
        b=pad_row(np.full(n, -0.15, np.float32)),   # bias1 == bias2
    )


# ----------------------------------------------------------------------------
# Pallas kernel: whole iterated propagation + decision loop, one batch tile.
# ----------------------------------------------------------------------------
def _predprey_kernel(layers, image_size, unroll,
                     prey_ref, pred_ref, x_ref, cave_ref,
                     wl_ref, wr_ref, wu_ref, wd_ref, b_ref,
                     u1_out, u2_out, dec_out):
    scalar = 20.0                                   # scalar1 == scalar2 (constant)

    u1_0 = prey_ref[...]                            # initial_hidden1 (prey)
    u2_0 = pred_ref[...]                            # initial_hidden2 (pred)
    x = x_ref[...]
    cave = jnp.where(cave_ref[...] == -1.0, 0.0, cave_ref[...])
    u1_fix = jnp.where(u1_0 == -1.0, 0.0, u1_0)     # u_fix[u_fix == -1] = 0
    u2_fix = jnp.where(u2_0 == -1.0, 0.0, u2_0)

    wl = wl_ref[...]
    wr = wr_ref[...]
    wu = wu_ref[...]
    wd = wd_ref[...]

    tb = u1_0.shape[0]
    hp = u1_0.shape[1]

    # Loop-invariant additive term, hoisted (a == 1 -> input contribution is x).
    cx = x + b_ref[...]
    c = jnp.concatenate([u1_fix + cx, u2_fix + cx], axis=0)   # (2*tb, hp)
    u = jnp.concatenate([u1_0, u2_0], axis=0)                 # (2*tb, hp)
    cave2 = jnp.concatenate([cave, cave], axis=0)             # hoisted out of loop

    d0 = jnp.zeros((tb, 1), jnp.float32)            # decision[:, 0]
    d1 = jnp.zeros((tb, 1), jnp.float32)            # decision[:, 1]

    # Positive roll amounts (mod hp).  Wrap-around lanes always land on zero
    # coefficients, so circular rotation implements the open-boundary stencil.
    s_l = 1                 # y[i] = u[i-1]
    s_r = hp - 1            # y[i] = u[i+1]
    s_u = image_size        # y[i] = u[i-imageSize]
    s_d = hp - image_size   # y[i] = u[i+imageSize]

    def body(_, carry):
        u, d0, d1 = carry
        # 4-neighbour stencil on the XLU (replaces the dense (H,H) MXU matmul).
        nb = (wl * pltpu.roll(u, s_l, axis=1)
              + wr * pltpu.roll(u, s_r, axis=1)
              + wu * pltpu.roll(u, s_u, axis=1)
              + wd * pltpu.roll(u, s_d, axis=1))
        u = jnp.tanh((c + nb) * scalar)
        r = jnp.sum(cave2 * u, axis=1, keepdims=True)          # one stacked reduce
        d0 = jax.nn.sigmoid(-100.0 * d1 + 20.0 * r[tb:])       # uses sum(cave*u2)
        d1 = jax.nn.sigmoid(-100.0 * d0 + 20.0 * r[:tb])       # uses new d0, sum(cave*u1)
        return (u, d0, d1)

    u, d0, d1 = jax.lax.fori_loop(0, layers, body, (u, d0, d1), unroll=unroll)

    u1_out[...] = u[:tb]
    u2_out[...] = u[tb:]
    # Lane-dense (128-wide) decision store: single unmasked vst, sliced outside.
    lane = jax.lax.broadcasted_iota(jnp.int32, (tb, dec_out.shape[1]), 1)
    dec_out[...] = jnp.where(lane == 0, d0, jnp.where(lane == 1, d1, 0.0))


# ----------------------------------------------------------------------------
# Wrapper: layout padding, tile picking, VMEM sizing, pallas_call.
# ----------------------------------------------------------------------------
def _vmem_budget_bytes():
    try:
        cap = int(pltpu.get_tpu_info().vmem_capacity_bytes)
    except Exception:
        cap = 64 << 20          # conservative fallback (v7x per-core VMEM)
    return (cap * 3) // 4       # leave pipeline / compiler headroom


def _pick_batch_tile(batch, hp, budget_bytes):
    # ~34 resident f32 rows of width hp per batch row (double-buffered I/O tiles
    # + stacked loop state & temporaries).  Shrink the tile, never the limit.
    bytes_per_row = 34 * hp * 4
    cap = max(8, (budget_bytes - (4 << 20)) // bytes_per_row)
    if batch < 16:
        return batch                       # single tile == full dim (layout-legal)
    upper = min(512, batch // 2, cap)      # >=2 grid steps so both v7x cores work
    upper -= upper % 8
    for tb in range(max(upper, 8), 7, -8):
        if batch % tb == 0:
            return tb
    return 8 if batch % 8 == 0 else batch


def fixed_predprey_forward(X, pred, prey, cave, image_size, layers, *, unroll=4):
    """Matches Fixed_PredPrey.forward(X, pred, prey, cave, dtype)
       -> (prey_range, pred_range, decision).

    iteratedLayer(prey, pred, X, X, cave):
        initial_hidden1 = prey, initial_hidden2 = pred, input1 = input2 = X.
    """
    batch, h = X.shape
    assert h == image_size * image_size
    hp = ((h + 127) // 128) * 128           # lane-dense hidden dim

    params = build_params(image_size, hp)

    def pad(arr):
        return arr if hp == h else jnp.pad(arr, ((0, 0), (0, hp - h)))

    Xp, predp, preyp, cavep = pad(X), pad(pred), pad(prey), pad(cave)

    budget = _vmem_budget_bytes()
    tb = _pick_batch_tile(batch, hp, budget)
    grid = (batch // tb,)

    tile_spec = pl.BlockSpec((tb, hp), lambda i: (i, 0))
    row_spec = pl.BlockSpec((1, hp), lambda i: (0, 0))
    dec_spec = pl.BlockSpec((tb, DEC_LANES), lambda i: (i, 0))

    tile_bytes = tb * hp * 4
    needed = (34 * tile_bytes               # double-buffered I/O tiles + loop temps
              + 10 * hp * 4                 # coefficient / bias rows (2 buffers)
              + 2 * tb * DEC_LANES * 4      # decision tile
              + (4 << 20))                  # headroom
    vmem_limit = int(min(max(needed, 32 << 20), budget))

    kernel = functools.partial(_predprey_kernel, layers, image_size,
                               max(1, min(unroll, layers)))
    u1p, u2p, decp = pl.pallas_call(
        kernel,
        grid=grid,
        out_shape=(
            jax.ShapeDtypeStruct((batch, hp), jnp.float32),        # prey_range
            jax.ShapeDtypeStruct((batch, hp), jnp.float32),        # pred_range
            jax.ShapeDtypeStruct((batch, DEC_LANES), jnp.float32), # decision (padded)
        ),
        in_specs=[tile_spec, tile_spec, tile_spec, tile_spec,      # prey, pred, X, cave
                  row_spec, row_spec, row_spec, row_spec, row_spec],
        out_specs=(tile_spec, tile_spec, dec_spec),
        compiler_params=pltpu.CompilerParams(
            dimension_semantics=("parallel",),
            vmem_limit_bytes=vmem_limit),
    )(preyp, predp, Xp, cavep,
      params["wl"], params["wr"], params["wu"], params["wd"], params["b"])

    return u1p[:, :h], u2p[:, :h], decp[:, :2]


# ----------------------------------------------------------------------------
# Pure-JAX reference (direct transcription of the PyTorch loop, dense weight).
# ----------------------------------------------------------------------------
def _dense_reference_weight(image_size):
    n = image_size * image_size
    w, has_l, has_r, has_u, has_d = _lattice_vectors(image_size)
    W = np.zeros((n, n), np.float32)
    idx = np.arange(n)
    W[idx[has_l], idx[has_l] - 1] = w[has_l]
    W[idx[has_r], idx[has_r] + 1] = w[has_r]
    W[idx[has_u], idx[has_u] - image_size] = w[has_u]
    W[idx[has_d], idx[has_d] + image_size] = w[has_d]
    return W


def reference_forward(X, pred, prey, cave, image_size, layers):
    W = jnp.asarray(_dense_reference_weight(image_size))
    b = jnp.full((1, X.shape[1]), -0.15, jnp.float32)
    u1, u2 = prey, pred
    u1_fix = jnp.where(u1 == -1.0, 0.0, u1)
    u2_fix = jnp.where(u2 == -1.0, 0.0, u2)
    cave = jnp.where(cave == -1.0, 0.0, cave)
    dec = jnp.zeros((X.shape[0], 2), jnp.float32)
    for _ in range(layers):
        u1 = jnp.tanh((u1_fix + u1 @ W.T + b + X) * 20.0)   # a1 == 1, diag input
        u2 = jnp.tanh((u2_fix + u2 @ W.T + b + X) * 20.0)
        d0 = jax.nn.sigmoid(-100.0 * dec[:, 1] + 20.0 * jnp.sum(cave * u2, axis=1))
        d1 = jax.nn.sigmoid(-100.0 * d0 + 20.0 * jnp.sum(cave * u1, axis=1))
        dec = jnp.stack([d0, d1], axis=1)
    return u1, u2, dec


if __name__ == "__main__":
    image_size = 4
    num_pixels = image_size * image_size    # hidden = D_input = 16
    layers = 4
    batch = 2

    key = jax.random.PRNGKey(0)
    k1, k2, k3, k4 = jax.random.split(key, 4)
    X = jax.random.uniform(k1, (batch, num_pixels), dtype=jnp.float32)
    prey = jax.random.randint(k2, (batch, num_pixels), -1, 2).astype(jnp.float32)
    pred = jax.random.randint(k3, (batch, num_pixels), -1, 2).astype(jnp.float32)
    cave = jax.random.randint(k4, (batch, num_pixels), -1, 2).astype(jnp.float32)

    prey_range, pred_range, decision = jax.block_until_ready(
        fixed_predprey_forward(X, pred, prey, cave, image_size, layers))

    # Tolerances absorb f32 reassociation (stencil adds vs. dense dot, hoisted
    # loop-invariant sums) amplified by the sharp tanh(20*v)/sigmoid(-100*d).
    r_prey, r_pred, r_dec = reference_forward(X, pred, prey, cave, image_size, layers)
    np.testing.assert_allclose(np.asarray(prey_range), np.asarray(r_prey),
                               rtol=2e-3, atol=2e-3)
    np.testing.assert_allclose(np.asarray(pred_range), np.asarray(r_pred),
                               rtol=2e-3, atol=2e-3)
    np.testing.assert_allclose(np.asarray(decision), np.asarray(r_dec),
                               rtol=2e-3, atol=2e-3)

    print("KERNEL_OK")
</pallas_src>

<mosaic_0001>
module attributes {stable_mosaic.version = 11 : i64} {
  func.func @_predprey_kernel(%arg0: i32, %arg1: memref<2x128xf32, #tpu.memory_space<vmem>>, %arg2: memref<2x128xf32, #tpu.memory_space<vmem>>, %arg3: memref<2x128xf32, #tpu.memory_space<vmem>>, %arg4: memref<2x128xf32, #tpu.memory_space<vmem>>, %arg5: memref<1x128xf32, #tpu.memory_space<vmem>>, %arg6: memref<1x128xf32, #tpu.memory_space<vmem>>, %arg7: memref<1x128xf32, #tpu.memory_space<vmem>>, %arg8: memref<1x128xf32, #tpu.memory_space<vmem>>, %arg9: memref<1x128xf32, #tpu.memory_space<vmem>>, %arg10: memref<2x128xf32, #tpu.memory_space<vmem>>, %arg11: memref<2x128xf32, #tpu.memory_space<vmem>>, %arg12: memref<2x128xf32, #tpu.memory_space<vmem>>) attributes {dimension_semantics = [#tpu.dimension_semantics<parallel>], iteration_bounds = array<i64: 1>, scalar_prefetch = 0 : i64, scratch_operands = 0 : i64, tpu.core_type = #tpu.core_type<tc>, window_params = [{transform_indices = @transform_0, window_bounds = array<i64: 2, 128>}, {transform_indices = @transform_1, window_bounds = array<i64: 2, 128>}, {transform_indices = @transform_2, window_bounds = array<i64: 2, 128>}, {transform_indices = @transform_3, window_bounds = array<i64: 2, 128>}, {pipeline_mode = #tpu.pipeline_mode<synchronous>, transform_indices = @transform_4, window_bounds = array<i64: 1, 128>}, {pipeline_mode = #tpu.pipeline_mode<synchronous>, transform_indices = @transform_5, window_bounds = array<i64: 1, 128>}, {pipeline_mode = #tpu.pipeline_mode<synchronous>, transform_indices = @transform_6, window_bounds = array<i64: 1, 128>}, {pipeline_mode = #tpu.pipeline_mode<synchronous>, transform_indices = @transform_7, window_bounds = array<i64: 1, 128>}, {pipeline_mode = #tpu.pipeline_mode<synchronous>, transform_indices = @transform_8, window_bounds = array<i64: 1, 128>}, {transform_indices = @transform_9, window_bounds = array<i64: 2, 128>}, {transform_indices = @transform_10, window_bounds = array<i64: 2, 128>}, {transform_indices = @transform_11, window_bounds = array<i64: 2, 128>}]} {
    %c0 = arith.constant 0 : index
    %c0_0 = arith.constant 0 : index
    %0 = vector.load %arg1[%c0, %c0_0] : memref<2x128xf32, #tpu.memory_space<vmem>>, vector<2x128xf32>
    %c0_1 = arith.constant 0 : index
    %c0_2 = arith.constant 0 : index
    %1 = vector.load %arg2[%c0_1, %c0_2] : memref<2x128xf32, #tpu.memory_space<vmem>>, vector<2x128xf32>
    %c0_3 = arith.constant 0 : index
    %c0_4 = arith.constant 0 : index
    %2 = vector.load %arg3[%c0_3, %c0_4] : memref<2x128xf32, #tpu.memory_space<vmem>>, vector<2x128xf32>
    %c0_5 = arith.constant 0 : index
    %c0_6 = arith.constant 0 : index
    %3 = vector.load %arg4[%c0_5, %c0_6] : memref<2x128xf32, #tpu.memory_space<vmem>>, vector<2x128xf32>
    %cst = arith.constant -1.000000e+00 : f32
    %4 = vector.broadcast %cst : f32 to vector<2x128xf32>
    %5 = arith.cmpf oeq, %3, %4 : vector<2x128xf32>
    %c0_7 = arith.constant 0 : index
    %c0_8 = arith.constant 0 : index
    %6 = vector.load %arg4[%c0_7, %c0_8] : memref<2x128xf32, #tpu.memory_space<vmem>>, vector<2x128xf32>
    %cst_9 = arith.constant 0.000000e+00 : f32
    %7 = vector.broadcast %cst_9 : f32 to vector<2x128xf32>
    %8 = arith.select %5, %7, %6 : vector<2x128xi1>, vector<2x128xf32>
    %cst_10 = arith.constant -1.000000e+00 : f32
    %9 = vector.broadcast %cst_10 : f32 to vector<2x128xf32>
    %10 = arith.cmpf oeq, %0, %9 : vector<2x128xf32>
    %cst_11 = arith.constant 0.000000e+00 : f32
    %11 = vector.broadcast %cst_11 : f32 to vector<2x128xf32>
    %12 = arith.select %10, %11, %0 : vector<2x128xi1>, vector<2x128xf32>
    %cst_12 = arith.constant -1.000000e+00 : f32
    %13 = vector.broadcast %cst_12 : f32 to vector<2x128xf32>
    %14 = arith.cmpf oeq, %1, %13 : vector<2x128xf32>
    %cst_13 = arith.constant 0.000000e+00 : f32
    %15 = vector.broadcast %cst_13 : f32 to vector<2x128xf32>
    %16 = arith.select %14, %15, %1 : vector<2x128xi1>, vector<2x128xf32>
    %c0_14 = arith.constant 0 : index
    %c0_15 = arith.constant 0 : index
    %17 = vector.load %arg5[%c0_14, %c0_15] : memref<1x128xf32, #tpu.memory_space<vmem>>, vector<1x128xf32>
    %c0_16 = arith.constant 0 : index
    %c0_17 = arith.constant 0 : index
    %18 = vector.load %arg6[%c0_16, %c0_17] : memref<1x128xf32, #tpu.memory_space<vmem>>, vector<1x128xf32>
    %c0_18 = arith.constant 0 : index
    %c0_19 = arith.constant 0 : index
    %19 = vector.load %arg7[%c0_18, %c0_19] : memref<1x128xf32, #tpu.memory_space<vmem>>, vector<1x128xf32>
    %c0_20 = arith.constant 0 : index
    %c0_21 = arith.constant 0 : index
    %20 = vector.load %arg8[%c0_20, %c0_21] : memref<1x128xf32, #tpu.memory_space<vmem>>, vector<1x128xf32>
    %c0_22 = arith.constant 0 : index
    %c0_23 = arith.constant 0 : index
    %21 = vector.load %arg9[%c0_22, %c0_23] : memref<1x128xf32, #tpu.memory_space<vmem>>, vector<1x128xf32>
    %22 = vector.broadcast %21 : vector<1x128xf32> to vector<2x128xf32>
    %23 = arith.addf %2, %22 : vector<2x128xf32>
    %24 = arith.addf %12, %23 : vector<2x128xf32>
    %25 = arith.addf %16, %23 : vector<2x128xf32>
    %26 = tpu.concatenate %24, %25 in 0 : vector<2x128xf32>, vector<2x128xf32> -> vector<4x128xf32>
    %27 = tpu.concatenate %0, %1 in 0 : vector<2x128xf32>, vector<2x128xf32> -> vector<4x128xf32>
    %28 = tpu.concatenate %8, %8 in 0 : vector<2x128xf32>, vector<2x128xf32> -> vector<4x128xf32>
    %cst_24 = arith.constant 0.000000e+00 : f32
    %29 = vector.broadcast %cst_24 : f32 to vector<2x1xf32>
    %cst_25 = arith.constant 0.000000e+00 : f32
    %30 = vector.broadcast %cst_25 : f32 to vector<2x1xf32>
    %c0_i32 = arith.constant 0 : i32
    %c1_i32 = arith.constant 1 : i32
    %31 = tpu.dynamic_rotate %27 by %c1_i32 dim 1 : vector<4x128xf32>, i32 -> vector<4x128xf32>
    %32 = vector.broadcast %17 : vector<1x128xf32> to vector<4x128xf32>
    %33 = arith.mulf %32, %31 : vector<4x128xf32>
    %c127_i32 = arith.constant 127 : i32
    %34 = tpu.dynamic_rotate %27 by %c127_i32 dim 1 : vector<4x128xf32>, i32 -> vector<4x128xf32>
    %35 = vector.broadcast %18 : vector<1x128xf32> to vector<4x128xf32>
    %36 = arith.mulf %35, %34 : vector<4x128xf32>
    %37 = arith.addf %33, %36 : vector<4x128xf32>
    %c4_i32 = arith.constant 4 : i32
    %38 = tpu.dynamic_rotate %27 by %c4_i32 dim 1 : vector<4x128xf32>, i32 -> vector<4x128xf32>
    %39 = vector.broadcast %19 : vector<1x128xf32> to vector<4x128xf32>
    %40 = arith.mulf %39, %38 : vector<4x128xf32>
    %41 = arith.addf %37, %40 : vector<4x128xf32>
    %c124_i32 = arith.constant 124 : i32
    %42 = tpu.dynamic_rotate %27 by %c124_i32 dim 1 : vector<4x128xf32>, i32 -> vector<4x128xf32>
    %43 = vector.broadcast %20 : vector<1x128xf32> to vector<4x128xf32>
    %44 = arith.mulf %43, %42 : vector<4x128xf32>
    %45 = arith.addf %41, %44 : vector<4x128xf32>
    %46 = arith.addf %26, %45 : vector<4x128xf32>
    %cst_26 = arith.constant 2.000000e+01 : f32
    %47 = vector.broadcast %cst_26 : f32 to vector<4x128xf32>
    %48 = arith.mulf %46, %47 : vector<4x128xf32>
    %49 = math.tanh %48 : vector<4x128xf32>
    %50 = arith.mulf %28, %49 : vector<4x128xf32>
    %cst_27 = arith.constant dense<0.000000e+00> : vector<4xf32>
    %51 = vector.multi_reduction <add>, %50, %cst_27 [1] : vector<4x128xf32> to vector<4xf32>
    %52 = vector.shape_cast %51 : vector<4xf32> to vector<4x1xf32>
    %cst_28 = arith.constant -1.000000e+02 : f32
    %53 = vector.broadcast %cst_28 : f32 to vector<2x1xf32>
    %54 = arith.mulf %53, %30 : vector<2x1xf32>
    %55 = vector.extract_strided_slice %52 {offsets = [2, 0], sizes = [2, 1], strides = [1, 1]} : vector<4x1xf32> to vector<2x1xf32>
    %cst_29 = arith.constant 2.000000e+01 : f32
    %56 = vector.broadcast %cst_29 : f32 to vector<2x1xf32>
    %57 = arith.mulf %56, %55 : vector<2x1xf32>
    %58 = arith.addf %54, %57 : vector<2x1xf32>
    %59 = arith.negf %58 : vector<2x1xf32>
    %60 = math.exp %59 : vector<2x1xf32>
    %cst_30 = arith.constant 1.000000e+00 : f32
    %61 = vector.broadcast %cst_30 : f32 to vector<2x1xf32>
    %62 = arith.addf %61, %60 : vector<2x1xf32>
    %63 = arith.divf %61, %62 : vector<2x1xf32>
    %cst_31 = arith.constant -1.000000e+02 : f32
    %64 = vector.broadcast %cst_31 : f32 to vector<2x1xf32>
    %65 = arith.mulf %64, %63 : vector<2x1xf32>
    %66 = vector.extract_strided_slice %52 {offsets = [0, 0], sizes = [2, 1], strides = [1, 1]} : vector<4x1xf32> to vector<2x1xf32>
    %cst_32 = arith.constant 2.000000e+01 : f32
    %67 = vector.broadcast %cst_32 : f32 to vector<2x1xf32>
    %68 = arith.mulf %67, %66 : vector<2x1xf32>
    %69 = arith.addf %65, %68 : vector<2x1xf32>
    %70 = arith.negf %69 : vector<2x1xf32>
    %71 = math.exp %70 : vector<2x1xf32>
    %cst_33 = arith.constant 1.000000e+00 : f32
    %72 = vector.broadcast %cst_33 : f32 to vector<2x1xf32>
    %73 = arith.addf %72, %71 : vector<2x1xf32>
    %74 = arith.divf %72, %73 : vector<2x1xf32>
    %c1_i32_34 = arith.constant 1 : i32
    %c1_i32_35 = arith.constant 1 : i32
    %75 = tpu.dynamic_rotate %49 by %c1_i32_35 dim 1 : vector<4x128xf32>, i32 -> vector<4x128xf32>
    %76 = vector.broadcast %17 : vector<1x128xf32> to vector<4x128xf32>
    %77 = arith.mulf %76, %75 : vector<4x128xf32>
    %c127_i32_36 = arith.constant 127 : i32
    %78 = tpu.dynamic_rotate %49 by %c127_i32_36 dim 1 : vector<4x128xf32>, i32 -> vector<4x128xf32>
    %79 = vector.broadcast %18 : vector<1x128xf32> to vector<4x128xf32>
    %80 = arith.mulf %79, %78 : vector<4x128xf32>
    %81 = arith.addf %77, %80 : vector<4x128xf32>
    %c4_i32_37 = arith.constant 4 : i32
    %82 = tpu.dynamic_rotate %49 by %c4_i32_37 dim 1 : vector<4x128xf32>, i32 -> vector<4x128xf32>
    %83 = vector.broadcast %19 : vector<1x128xf32> to vector<4x128xf32>
    %84 = arith.mulf %83, %82 : vector<4x128xf32>
    %85 = arith.addf %81, %84 : vector<4x128xf32>
    %c124_i32_38 = arith.constant 124 : i32
    %86 = tpu.dynamic_rotate %49 by %c124_i32_38 dim 1 : vector<4x128xf32>, i32 -> vector<4x128xf32>
    %87 = vector.broadcast %20 : vector<1x128xf32> to vector<4x128xf32>
    %88 = arith.mulf %87, %86 : vector<4x128xf32>
    %89 = arith.addf %85, %88 : vector<4x128xf32>
    %90 = arith.addf %26, %89 : vector<4x128xf32>
    %cst_39 = arith.constant 2.000000e+01 : f32
    %91 = vector.broadcast %cst_39 : f32 to vector<4x128xf32>
    %92 = arith.mulf %90, %91 : vector<4x128xf32>
    %93 = math.tanh %92 : vector<4x128xf32>
    %94 = arith.mulf %28, %93 : vector<4x128xf32>
    %cst_40 = arith.constant dense<0.000000e+00> : vector<4xf32>
    %95 = vector.multi_reduction <add>, %94, %cst_40 [1] : vector<4x128xf32> to vector<4xf32>
    %96 = vector.shape_cast %95 : vector<4xf32> to vector<4x1xf32>
    %cst_41 = arith.constant -1.000000e+02 : f32
    %97 = vector.broadcast %cst_41 : f32 to vector<2x1xf32>
    %98 = arith.mulf %97, %74 : vector<2x1xf32>
    %99 = vector.extract_strided_slice %96 {offsets = [2, 0], sizes = [2, 1], strides = [1, 1]} : vector<4x1xf32> to vector<2x1xf32>
    %cst_42 = arith.constant 2.000000e+01 : f32
    %100 = vector.broadcast %cst_42 : f32 to vector<2x1xf32>
    %101 = arith.mulf %100, %99 : vector<2x1xf32>
    %102 = arith.addf %98, %101 : vector<2x1xf32>
    %103 = arith.negf %102 : vector<2x1xf32>
    %104 = math.exp %103 : vector<2x1xf32>
    %cst_43 = arith.constant 1.000000e+00 : f32
    %105 = vector.broadcast %cst_43 : f32 to vector<2x1xf32>
    %106 = arith.addf %105, %104 : vector<2x1xf32>
    %107 = arith.divf %105, %106 : vector<2x1xf32>
    %cst_44 = arith.constant -1.000000e+02 : f32
    %108 = vector.broadcast %cst_44 : f32 to vector<2x1xf32>
    %109 = arith.mulf %108, %107 : vector<2x1xf32>
    %110 = vector.extract_strided_slice %96 {offsets = [0, 0], sizes = [2, 1], strides = [1, 1]} : vector<4x1xf32> to vector<2x1xf32>
    %cst_45 = arith.constant 2.000000e+01 : f32
    %111 = vector.broadcast %cst_45 : f32 to vector<2x1xf32>
    %112 = arith.mulf %111, %110 : vector<2x1xf32>
    %113 = arith.addf %109, %112 : vector<2x1xf32>
    %114 = arith.negf %113 : vector<2x1xf32>
    %115 = math.exp %114 : vector<2x1xf32>
    %cst_46 = arith.constant 1.000000e+00 : f32
    %116 = vector.broadcast %cst_46 : f32 to vector<2x1xf32>
    %117 = arith.addf %116, %115 : vector<2x1xf32>
    %118 = arith.divf %116, %117 : vector<2x1xf32>
    %c2_i32 = arith.constant 2 : i32
    %c1_i32_47 = arith.constant 1 : i32
    %119 = tpu.dynamic_rotate %93 by %c1_i32_47 dim 1 : vector<4x128xf32>, i32 -> vector<4x128xf32>
    %120 = vector.broadcast %17 : vector<1x128xf32> to vector<4x128xf32>
    %121 = arith.mulf %120, %119 : vector<4x128xf32>
    %c127_i32_48 = arith.constant 127 : i32
    %122 = tpu.dynamic_rotate %93 by %c127_i32_48 dim 1 : vector<4x128xf32>, i32 -> vector<4x128xf32>
    %123 = vector.broadcast %18 : vector<1x128xf32> to vector<4x128xf32>
    %124 = arith.mulf %123, %122 : vector<4x128xf32>
    %125 = arith.addf %121, %124 : vector<4x128xf32>
    %c4_i32_49 = arith.constant 4 : i32
    %126 = tpu.dynamic_rotate %93 by %c4_i32_49 dim 1 : vector<4x128xf32>, i32 -> vector<4x128xf32>
    %127 = vector.broadcast %19 : vector<1x128xf32> to vector<4x128xf32>
    %128 = arith.mulf %127, %126 : vector<4x128xf32>
    %129 = arith.addf %125, %128 : vector<4x128xf32>
    %c124_i32_50 = arith.constant 124 : i32
    %130 = tpu.dynamic_rotate %93 by %c124_i32_50 dim 1 : vector<4x128xf32>, i32 -> vector<4x128xf32>
    %131 = vector.broadcast %20 : vector<1x128xf32> to vector<4x128xf32>
    %132 = arith.mulf %131, %130 : vector<4x128xf32>
    %133 = arith.addf %129, %132 : vector<4x128xf32>
    %134 = arith.addf %26, %133 : vector<4x128xf32>
    %cst_51 = arith.constant 2.000000e+01 : f32
    %135 = vector.broadcast %cst_51 : f32 to vector<4x128xf32>
    %136 = arith.mulf %134, %135 : vector<4x128xf32>
    %137 = math.tanh %136 : vector<4x128xf32>
    %138 = arith.mulf %28, %137 : vector<4x128xf32>
    %cst_52 = arith.constant dense<0.000000e+00> : vector<4xf32>
    %139 = vector.multi_reduction <add>, %138, %cst_52 [1] : vector<4x128xf32> to vector<4xf32>
    %140 = vector.shape_cast %139 : vector<4xf32> to vector<4x1xf32>
    %cst_53 = arith.constant -1.000000e+02 : f32
    %141 = vector.broadcast %cst_53 : f32 to vector<2x1xf32>
    %142 = arith.mulf %141, %118 : vector<2x1xf32>
    %143 = vector.extract_strided_slice %140 {offsets = [2, 0], sizes = [2, 1], strides = [1, 1]} : vector<4x1xf32> to vector<2x1xf32>
    %cst_54 = arith.constant 2.000000e+01 : f32
    %144 = vector.broadcast %cst_54 : f32 to vector<2x1xf32>
    %145 = arith.mulf %144, %143 : vector<2x1xf32>
    %146 = arith.addf %142, %145 : vector<2x1xf32>
    %147 = arith.negf %146 : vector<2x1xf32>
    %148 = math.exp %147 : vector<2x1xf32>
    %cst_55 = arith.constant 1.000000e+00 : f32
    %149 = vector.broadcast %cst_55 : f32 to vector<2x1xf32>
    %150 = arith.addf %149, %148 : vector<2x1xf32>
    %151 = arith.divf %149, %150 : vector<2x1xf32>
    %cst_56 = arith.constant -1.000000e+02 : f32
    %152 = vector.broadcast %cst_56 : f32 to vector<2x1xf32>
    %153 = arith.mulf %152, %151 : vector<2x1xf32>
    %154 = vector.extract_strided_slice %140 {offsets = [0, 0], sizes = [2, 1], strides = [1, 1]} : vector<4x1xf32> to vector<2x1xf32>
    %cst_57 = arith.constant 2.000000e+01 : f32
    %155 = vector.broadcast %cst_57 : f32 to vector<2x1xf32>
    %156 = arith.mulf %155, %154 : vector<2x1xf32>
    %157 = arith.addf %153, %156 : vector<2x1xf32>
    %158 = arith.negf %157 : vector<2x1xf32>
    %159 = math.exp %158 : vector<2x1xf32>
    %cst_58 = arith.constant 1.000000e+00 : f32
    %160 = vector.broadcast %cst_58 : f32 to vector<2x1xf32>
    %161 = arith.addf %160, %159 : vector<2x1xf32>
    %162 = arith.divf %160, %161 : vector<2x1xf32>
    %c3_i32 = arith.constant 3 : i32
    %c1_i32_59 = arith.constant 1 : i32
    %163 = tpu.dynamic_rotate %137 by %c1_i32_59 dim 1 : vector<4x128xf32>, i32 -> vector<4x128xf32>
    %164 = vector.broadcast %17 : vector<1x128xf32> to vector<4x128xf32>
    %165 = arith.mulf %164, %163 : vector<4x128xf32>
    %c127_i32_60 = arith.constant 127 : i32
    %166 = tpu.dynamic_rotate %137 by %c127_i32_60 dim 1 : vector<4x128xf32>, i32 -> vector<4x128xf32>
    %167 = vector.broadcast %18 : vector<1x128xf32> to vector<4x128xf32>
    %168 = arith.mulf %167, %166 : vector<4x128xf32>
    %169 = arith.addf %165, %168 : vector<4x128xf32>
    %c4_i32_61 = arith.constant 4 : i32
    %170 = tpu.dynamic_rotate %137 by %c4_i32_61 dim 1 : vector<4x128xf32>, i32 -> vector<4x128xf32>
    %171 = vector.broadcast %19 : vector<1x128xf32> to vector<4x128xf32>
    %172 = arith.mulf %171, %170 : vector<4x128xf32>
    %173 = arith.addf %169, %172 : vector<4x128xf32>
    %c124_i32_62 = arith.constant 124 : i32
    %174 = tpu.dynamic_rotate %137 by %c124_i32_62 dim 1 : vector<4x128xf32>, i32 -> vector<4x128xf32>
    %175 = vector.broadcast %20 : vector<1x128xf32> to vector<4x128xf32>
    %176 = arith.mulf %175, %174 : vector<4x128xf32>
    %177 = arith.addf %173, %176 : vector<4x128xf32>
    %178 = arith.addf %26, %177 : vector<4x128xf32>
    %cst_63 = arith.constant 2.000000e+01 : f32
    %179 = vector.broadcast %cst_63 : f32 to vector<4x128xf32>
    %180 = arith.mulf %178, %179 : vector<4x128xf32>
    %181 = math.tanh %180 : vector<4x128xf32>
    %182 = arith.mulf %28, %181 : vector<4x128xf32>
    %cst_64 = arith.constant dense<0.000000e+00> : vector<4xf32>
    %183 = vector.multi_reduction <add>, %182, %cst_64 [1] : vector<4x128xf32> to vector<4xf32>
    %184 = vector.shape_cast %183 : vector<4xf32> to vector<4x1xf32>
    %cst_65 = arith.constant -1.000000e+02 : f32
    %185 = vector.broadcast %cst_65 : f32 to vector<2x1xf32>
    %186 = arith.mulf %185, %162 : vector<2x1xf32>
    %187 = vector.extract_strided_slice %184 {offsets = [2, 0], sizes = [2, 1], strides = [1, 1]} : vector<4x1xf32> to vector<2x1xf32>
    %cst_66 = arith.constant 2.000000e+01 : f32
    %188 = vector.broadcast %cst_66 : f32 to vector<2x1xf32>
    %189 = arith.mulf %188, %187 : vector<2x1xf32>
    %190 = arith.addf %186, %189 : vector<2x1xf32>
    %191 = arith.negf %190 : vector<2x1xf32>
    %192 = math.exp %191 : vector<2x1xf32>
    %cst_67 = arith.constant 1.000000e+00 : f32
    %193 = vector.broadcast %cst_67 : f32 to vector<2x1xf32>
    %194 = arith.addf %193, %192 : vector<2x1xf32>
    %195 = arith.divf %193, %194 : vector<2x1xf32>
    %cst_68 = arith.constant -1.000000e+02 : f32
    %196 = vector.broadcast %cst_68 : f32 to vector<2x1xf32>
    %197 = arith.mulf %196, %195 : vector<2x1xf32>
    %198 = vector.extract_strided_slice %184 {offsets = [0, 0], sizes = [2, 1], strides = [1, 1]} : vector<4x1xf32> to vector<2x1xf32>
    %cst_69 = arith.constant 2.000000e+01 : f32
    %199 = vector.broadcast %cst_69 : f32 to vector<2x1xf32>
    %200 = arith.mulf %199, %198 : vector<2x1xf32>
    %201 = arith.addf %197, %200 : vector<2x1xf32>
    %202 = arith.negf %201 : vector<2x1xf32>
    %203 = math.exp %202 : vector<2x1xf32>
    %cst_70 = arith.constant 1.000000e+00 : f32
    %204 = vector.broadcast %cst_70 : f32 to vector<2x1xf32>
    %205 = arith.addf %204, %203 : vector<2x1xf32>
    %206 = arith.divf %204, %205 : vector<2x1xf32>
    %207 = vector.extract_strided_slice %181 {offsets = [0, 0], sizes = [2, 128], strides = [1, 1]} : vector<4x128xf32> to vector<2x128xf32>
    %c0_71 = arith.constant 0 : index
    %c0_72 = arith.constant 0 : index
    %208 = vector.load %arg10[%c0_71, %c0_72] : memref<2x128xf32, #tpu.memory_space<vmem>>, vector<2x128xf32>
    tpu.vector_store %arg10[%c0_71, %c0_72], %207 {strides = array<i32>} : memref<2x128xf32, #tpu.memory_space<vmem>>, vector<2x128xf32>,
    %209 = vector.extract_strided_slice %181 {offsets = [2, 0], sizes = [2, 128], strides = [1, 1]} : vector<4x128xf32> to vector<2x128xf32>
    %c0_73 = arith.constant 0 : index
    %c0_74 = arith.constant 0 : index
    %210 = vector.load %arg11[%c0_73, %c0_74] : memref<2x128xf32, #tpu.memory_space<vmem>>, vector<2x128xf32>
    tpu.vector_store %arg11[%c0_73, %c0_74], %209 {strides = array<i32>} : memref<2x128xf32, #tpu.memory_space<vmem>>, vector<2x128xf32>,
    %211 = tpu.iota {dimensions = array<i32: 1>} : vector<2x128xi32>
    %c0_i32_75 = arith.constant 0 : i32
    %212 = vector.broadcast %c0_i32_75 : i32 to vector<2x128xi32>
    %213 = arith.cmpi eq, %211, %212 : vector<2x128xi32>
    %c1_i32_76 = arith.constant 1 : i32
    %214 = vector.broadcast %c1_i32_76 : i32 to vector<2x128xi32>
    %215 = arith.cmpi eq, %211, %214 : vector<2x128xi32>
    %cst_77 = arith.constant 0.000000e+00 : f32
    %216 = vector.shape_cast %206 : vector<2x1xf32> to vector<2x1xf32>
    %217 = vector.broadcast %216 : vector<2x1xf32> to vector<2x128xf32>
    %218 = vector.broadcast %cst_77 : f32 to vector<2x128xf32>
    %219 = arith.select %215, %217, %218 : vector<2x128xi1>, vector<2x128xf32>
    %220 = vector.shape_cast %195 : vector<2x1xf32> to vector<2x1xf32>
    %221 = vector.broadcast %220 : vector<2x1xf32> to vector<2x128xf32>
    %222 = arith.select %213, %221, %219 : vector<2x128xi1>, vector<2x128xf32>
    %c0_78 = arith.constant 0 : index
    %c0_79 = arith.constant 0 : index
    %223 = vector.load %arg12[%c0_78, %c0_79] : memref<2x128xf32, #tpu.memory_space<vmem>>, vector<2x128xf32>
    tpu.vector_store %arg12[%c0_78, %c0_79], %222 {strides = array<i32>} : memref<2x128xf32, #tpu.memory_space<vmem>>, vector<2x128xf32>,
    return
  }
  func.func @transform_0(%arg0: i32) -> (i32, i32) {
    %c0_i32 = arith.constant 0 : i32
    %c0_i32_0 = arith.constant 0 : i32
    return %arg0, %c0_i32 : i32, i32
  }
  func.func @transform_1(%arg0: i32) -> (i32, i32) {
    %c0_i32 = arith.constant 0 : i32
    %c0_i32_0 = arith.constant 0 : i32
    return %arg0, %c0_i32 : i32, i32
  }
  func.func @transform_2(%arg0: i32) -> (i32, i32) {
    %c0_i32 = arith.constant 0 : i32
    %c0_i32_0 = arith.constant 0 : i32
    return %arg0, %c0_i32 : i32, i32
  }
  func.func @transform_3(%arg0: i32) -> (i32, i32) {
    %c0_i32 = arith.constant 0 : i32
    %c0_i32_0 = arith.constant 0 : i32
    return %arg0, %c0_i32 : i32, i32
  }
  func.func @transform_4(%arg0: i32) -> (i32, i32) {
    %c0_i32 = arith.constant 0 : i32
    %c0_i32_0 = arith.constant 0 : i32
    %c0_i32_1 = arith.constant 0 : i32
    return %c0_i32, %c0_i32_0 : i32, i32
  }
  func.func @transform_5(%arg0: i32) -> (i32, i32) {
    %c0_i32 = arith.constant 0 : i32
    %c0_i32_0 = arith.constant 0 : i32
    %c0_i32_1 = arith.constant 0 : i32
    return %c0_i32, %c0_i32_0 : i32, i32
  }
  func.func @transform_6(%arg0: i32) -> (i32, i32) {
    %c0_i32 = arith.constant 0 : i32
    %c0_i32_0 = arith.constant 0 : i32
    %c0_i32_1 = arith.constant 0 : i32
    return %c0_i32, %c0_i32_0 : i32, i32
  }
  func.func @transform_7(%arg0: i32) -> (i32, i32) {
    %c0_i32 = arith.constant 0 : i32
    %c0_i32_0 = arith.constant 0 : i32
    %c0_i32_1 = arith.constant 0 : i32
    return %c0_i32, %c0_i32_0 : i32, i32
  }
  func.func @transform_8(%arg0: i32) -> (i32, i32) {
    %c0_i32 = arith.constant 0 : i32
    %c0_i32_0 = arith.constant 0 : i32
    %c0_i32_1 = arith.constant 0 : i32
    return %c0_i32, %c0_i32_0 : i32, i32
  }
  func.func @transform_9(%arg0: i32) -> (i32, i32) {
    %c0_i32 = arith.constant 0 : i32
    %c0_i32_0 = arith.constant 0 : i32
    return %arg0, %c0_i32 : i32, i32
  }
  func.func @transform_10(%arg0: i32) -> (i32, i32) {
    %c0_i32 = arith.constant 0 : i32
    %c0_i32_0 = arith.constant 0 : i32
    return %arg0, %c0_i32 : i32, i32
  }
  func.func @transform_11(%arg0: i32) -> (i32, i32) {
    %c0_i32 = arith.constant 0 : i32
    %c0_i32_0 = arith.constant 0 : i32
    return %arg0, %c0_i32 : i32, i32
  }
}

</mosaic_0001>

<bundles_post_ra>
// kernel: tpu_custom_call.1
= control target key start
LH: loop header
LB: loop body
LE: loop exit
PB: predicated region body
PF: predicated region fallthrough
CT: control target
= control target key end

     0   :  { %17 = vsyncpa [#allocation3], 0  ;;  %s847_s0 = inlined_call_operand.hbm [shape: f32[2,128], index: 0, kind: input, shape index: {}]   ;;  %s848_s1 = inlined_call_operand.hbm [shape: f32[2,128], index: 1, kind: input, shape index: {}]   ;;  %s849_s2 = inlined_call_operand.hbm [shape: f32[2,128], index: 2, kind: input, shape index: {}]   ;;  %s850_s3 = inlined_call_operand.vmem [shape: f32[2,128], index: 3, kind: input, shape index: {}]   ;;  %s851_s4 = inlined_call_operand.vmem [shape: f32[1,128], index: 4, kind: input, shape index: {}]   ;;  %s852_s5 = inlined_call_operand.vmem [shape: f32[1,128], index: 5, kind: input, shape index: {}]   ;;  %s853_s6 = inlined_call_operand.vmem [shape: f32[1,128], index: 6, kind: input, shape index: {}]   ;;  %s854_s7 = inlined_call_operand.vmem [shape: f32[1,128], index: 7, kind: input, shape index: {}]   ;;  %s855_s8 = inlined_call_operand.vmem [shape: f32[1,128], index: 8, kind: input, shape index: {}]   ;;  %s856_s9 = inlined_call_operand.hbm [shape: f32[2,128], index: 9, kind: output, shape index: {0}]   ;;  %s857_s10 = inlined_call_operand.hbm [shape: f32[2,128], index: 10, kind: output, shape index: {1}]   ;;  %s858_s11 = inlined_call_operand.hbm [shape: f32[2,128], index: 11, kind: output, shape index: {2}]  }
   0x1   :  { %18 = vsyncpa [#allocation6], 0 }
   0x2   :  { %19 = vsyncpa [#allocation4], 0  ;;  %s37_s19 = sshll.u32 %s848_s1, 4  ;;  %s38_s19 = int_to_ptr.hbm [resolvable:$true] %s37_s19 }
   0x3   :  { %20 = vsyncpa [#allocation10], 0  ;;  %s681_s20 = smov [#allocation5]   ;;  %s26_s24 = sshll.u32 %s847_s0, 4  ;;  %s27_s24 = int_to_ptr.hbm [resolvable:$true] %s26_s24 }
   0x4   :  { %s39_s21 = sshll.u32 %s681_s20, 4  ;;  %s682_s25 = smov [#allocation2]   ;;  %s40_s21 = int_to_ptr.vmem [resolvable:$true] %s39_s21 }
   0x5   :  { %42 = dma.hbm_to_vmem [thread:$0]  %s38_s19, 32, %s40_s21, [#allocation6]  }
   0x6   :  { %s28_s26 = sshll.u32 %s682_s25, 4  ;;  %s48_s29 = sshll.u32 %s849_s2, 4  ;;  %s29_s26 = int_to_ptr.vmem [resolvable:$true] %s28_s26  ;;  %s49_s29 = int_to_ptr.hbm [resolvable:$true] %s48_s29 }
   0x7   :  { %31 = dma.hbm_to_vmem [thread:$0]  %s27_s24, 32, %s29_s26, [#allocation3]  }
   0x8   :  { %s683_s1 = smov [#allocation7]  }
   0x9   :  { %s50_s30 = sshll.u32 %s683_s1, 4  ;;  %s51_s30 = int_to_ptr.vmem [resolvable:$true] %s50_s30 }
   0xa   :  { %53 = dma.hbm_to_vmem [thread:$0]  %s49_s29, 32, %s51_s30, [#allocation6]  }
   0xb   :  { %673 = dma.done.wait [#allocation3], 32  }
   0xc   :  { %674 = vsyncadd [#allocation3], 4294967264 }
   0xd   :  { %675 = dma.done.wait [#allocation6], 64  }
   0xe   :  { %676 = vsyncadd [#allocation6], 4294967232  ;;  %vm102_vm0 = vcmask 1041408   ;;  %v78_v0 = vld [vmem:[#allocation2] sm:$0x3]  ;;  %s684_s2 = smov 1  }
   0xf   :  { %v79_v1 = vld [vmem:[#allocation5] sm:$0x3]  ;;  %v80_v2 = vld [vmem:[#allocation7] sm:$0x3]  ;;  %v484_v3 = vld [vmem:[%s855_s8] ss:$0 sm:$0xff] }
  0x10   :  { %vm86_vm1 = vcmp.eq.f32.partialorder %v79_v1, -1.0  ;;  %v105_v4 = vrot.slane %v79_v1, 6  ;;  %vm84_vm2 = vcmp.eq.f32.partialorder %v78_v0, -1.0  ;;  %v96_v6 = vadd.f32 %v484_v3, %v80_v2  ;;  %s685_s13 = smov 4   ;;  %s686_s8 = smov 127  }
  0x11   :  { %v87_v5 = vsel %vm86_vm1, 0.0, %v79_v1  ;;  %v85_v8 = vsel %vm84_vm2, 0.0, %v78_v0  ;;  %s687_s14 = smov 124   ;;  %v775_v15 = vld [vmem:[%s851_s4] ss:$0 sm:$0xff]  ;;  %vm143_vm4 = vcmask 1043456  }
  0x12   :  { %v107_v7 = vsel %vm102_vm0, %v78_v0, %v105_v4  ;;  %v98_v9 = vadd.f32 %v96_v6, %v87_v5  ;;  %v97_v10 = vadd.f32 %v96_v6, %v85_v8  ;;  %v780_v16 = vld [vmem:[%s852_s5] ss:$0 sm:$0xff]  ;;  %s432_s24 = sshll.u32 %s857_s10, 4  ;;  %s421_s27 = sshll.u32 %s856_s9, 4  ;;  %s433_s24 = int_to_ptr.hbm [resolvable:$true] %s432_s24  ;;  %s422_s27 = int_to_ptr.hbm [resolvable:$true] %s421_s27 }
  0x13   :  { %112 = vrot.lane.b32.xlu0 %v107_v7, %s684_s2  ;;  %125 = vrot.lane.b32.xlu1 %v107_v7, %s685_s13  ;;  %v785_v17 = vld [vmem:[%s853_s6] ss:$0 sm:$0xff]  ;;  %s690_s28 = smov [#allocation8]   ;;  %s691_s9 = smov [#allocation11]  }
  0x14   :  { %v100_v11 = vrot.slane %v98_v9, 6  ;;  %v790_v18 = vld [vmem:[%s854_s7] ss:$0 sm:$0xff]  ;;  %s419_s29 = sshll.u32 %s690_s28, 4  ;;  %s441_s10 = sshll.u32 %s691_s9, 4  ;;  %s420_s29 = int_to_ptr.vmem [resolvable:$true] %s419_s29  ;;  %s442_s10 = int_to_ptr.vmem [resolvable:$true] %s441_s10 }
  0x15   :  { %v81_v26 = vld [vmem:[%s850_s3] sm:$0x3]  ;;  %s689_s3 = smov [#allocation9]   ;;  %s443_s0 = sshll.u32 %s858_s11, 4  ;;  %s444_s0 = int_to_ptr.hbm [resolvable:$true] %s443_s0 }
  0x16   :  { %v768_v12 = vsel %vm102_vm0, %v97_v10, %v100_v11  ;;  %vm82_vm3 = vcmp.eq.f32.partialorder %v81_v26, -1.0  ;;  %s430_s6 = sshll.u32 %s689_s3, 4  ;;  %s431_s6 = int_to_ptr.vmem [resolvable:$true] %s430_s6 }
  0x17   :  { %v83_v30 = vsel %vm82_vm3, 0.0, %v81_v26 }
  0x18   :  { %v109_v32 = vrot.slane %v83_v30, 6 }
  0x1a   :  { %v801_v33 = vsel %vm102_vm0, %v83_v30, %v109_v32 }
  0x1b   :  { %118 = vrot.lane.b32.xlu0 %v107_v7, %s686_s8  ;;  %132 = vrot.lane.b32.xlu1 %v107_v7, %s687_s14 }
  0x85   :  { %v113_v13 = vpop.permute.xlu0 %112  ;;  %v126_v14 = vpop.permute.xlu1 %125 }
  0x86   :  { %v117_v21 = vmul.f32 %v775_v15, %v113_v13  ;;  %v130_v23 = vmul.f32 %v785_v17, %v126_v14 }
  0x8d   :  { %v119_v19 = vpop.permute.xlu0 %118  ;;  %v133_v20 = vpop.permute.xlu1 %132 }
  0x8e   :  { %v123_v22 = vmul.f32 %v780_v16, %v119_v19  ;;  %v137_v25 = vmul.f32 %v790_v18, %v133_v20 }
  0x90   :  { %v124_v24 = vadd.f32 %v123_v22, %v117_v21 }
  0x92   :  { %v131_v27 = vadd.f32 %v130_v23, %v124_v24 }
  0x94   :  { %v138_v28 = vadd.f32 %v137_v25, %v131_v27 }
  0x96   :  { %v139_v29 = vadd.f32 %v138_v28, %v768_v12 }
  0x98   :  { %v140_v31 = vmul.f32 20.0, %v139_v29 }
  0x9a   :  { %489 = vtanh.f32 %v140_v31 }
  0xa0   :  { %v490_v34 = vpop.eup %489 }
  0xa1   :  { %198 = vrot.lane.b32.xlu1 %v490_v34, %s685_s13  ;;  %194 = vrot.lane.b32.xlu0 %v490_v34, %s686_s8  ;;  %v142_v35 = vmul.f32 %v490_v34, %v801_v33 }
  0xa3   :  { %v144_v36 = vsel %vm143_vm4, %v142_v35, 0.0 }
  0xa4   :  { %145 = vadd.xlane.f32.xlu2 %v144_v36 }
  0xa9   :  { %202 = vrot.lane.b32.xlu0 %v490_v34, %s687_s14 }
  0xbc   :  { %191 = vrot.lane.b32.xlu2 %v490_v34, %s684_s2 }
 0x113   :  { %v195_v37 = vpop.permute.xlu0 %194  ;;  %v199_v39 = vpop.permute.xlu1 %198 }
 0x114   :  { %v196_v41 = vmul.f32 %v780_v16, %v195_v37  ;;  %v200_v44 = vmul.f32 %v785_v17, %v199_v39 }
 0x117   :  { %v146_v38 = vpop.xlane.xlu2 %145 }
 0x118   :  { %v463_v54 = vmul.f32 -20.0, %v146_v38  ;;  %v147_v4 = vmul.f32 20.0, %v146_v38 }
 0x11a   :  { %v149_v55 = vmul.f32 1.442695, %v463_v54  ;;  %v169_v8 = vrot.slane %v147_v4, 6 }
 0x11b   :  { %v203_v43 = vpop.permute.xlu0 %202 }
 0x11c   :  { %v204_v46 = vmul.f32 %v790_v18, %v203_v43 }
 0x11f   :  { %v192_v40 = vpop.permute.xlu2 %191 }
 0x120   :  { %v193_v42 = vmul.f32 %v775_v15, %v192_v40 }
 0x122   :  { %v197_v45 = vadd.f32 %v196_v41, %v193_v42 }
 0x124   :  { %v201_v47 = vadd.f32 %v200_v44, %v197_v45 }
 0x126   :  { %v205_v48 = vadd.f32 %v204_v46, %v201_v47 }
 0x128   :  { %v206_v49 = vadd.f32 %v205_v48, %v768_v12 }
 0x12a   :  { %v207_v50 = vmul.f32 20.0, %v206_v49 }
 0x12c   :  { %491 = vtanh.f32 %v207_v50 }
 0x12d   :  { %493 = vpow2.f32 %v149_v55 }
 0x132   :  { %v492_v51 = vpop.eup %491 }
 0x133   :  { %262 = vrot.lane.b32.xlu2 %v492_v51, %s686_s8  ;;  %259 = vrot.lane.b32.xlu0 %v492_v51, %s684_s2  ;;  %v209_v52 = vmul.f32 %v492_v51, %v801_v33  ;;  %v494_v56 = vpop.eup %493 }
 0x134   :  { %v151_v57 = vadd.f32 1.0, %v494_v56 }
 0x135   :  { %v210_v53 = vsel %vm143_vm4, %v209_v52, 0.0 }
 0x136   :  { %211 = vadd.xlane.f32.xlu1 %v210_v53  ;;  %495 = vrcp.f32 %v151_v57  ;;  %v163_v63 = vand.u32 2147483648, %v151_v57  ;;  %vm157_vm6 = vweird.f32 %v151_v57  ;;  %v161_v0 = vand.u32 2147483647, %v151_v57 }
 0x138   :  { %v164_v2 = vor.u32 1.1754944e-38, %v163_v63  ;;  %vm162_vm8 = vcmp.eq.f32.partialorder %v161_v0, 8.507059e+37 }
 0x13b   :  { %270 = vrot.lane.b32.xlu2 %v492_v51, %s687_s14  ;;  %266 = vrot.lane.b32.xlu0 %v492_v51, %s685_s13 }
 0x13c   :  { %v496_v58 = vpop.eup %495 }
 0x13d   :  { %v153_v59 = vmul.f32 %v496_v58, %v151_v57  ;;  %vm158_vm5 = vweird.f32 %v496_v58 }
 0x13e   :  { %vm159_vm7 = vmor %vm157_vm6, %vm158_vm5 }
 0x13f   :  { %v154_v60 = vsub.f32 1.0, %v153_v59 }
 0x141   :  { %v155_v61 = vmul.f32 %v496_v58, %v154_v60 }
 0x143   :  { %v156_v62 = vadd.f32 %v496_v58, %v155_v61 }
 0x145   :  { %v160_v1 = vsel %vm159_vm7, %v496_v58, %v156_v62 }
 0x146   :  { %v165_v3 = vsel %vm162_vm8, %v164_v2, %v160_v1 }
 0x147   :  { %v167_v6 = vmul.f32 -100.0, %v165_v3 }
 0x149   :  { %v171_v9 = vadd.f32 %v169_v8, %v167_v6 }
 0x14b   :  { %v464_v11 = vmul.f32 -1.442695, %v171_v9 }
 0x14d   :  { %497 = vpow2.f32 %v464_v11 }
 0x153   :  { %v498_v26 = vpop.eup %497 }
 0x154   :  { %v175_v28 = vadd.f32 1.0, %v498_v26 }
 0x156   :  { %v187_v38 = vand.u32 2147483648, %v175_v28  ;;  %vm181_vm10 = vweird.f32 %v175_v28  ;;  %v185_v39 = vand.u32 2147483647, %v175_v28 }
 0x158   :  { %v188_v41 = vor.u32 1.1754944e-38, %v187_v38  ;;  %vm186_vm12 = vcmp.eq.f32.partialorder %v185_v39, 8.507059e+37 }
 0x18d   :  { %v263_v5 = vpop.permute.xlu2 %262 }
 0x18e   :  { %v264_v13 = vmul.f32 %v780_v16, %v263_v5 }
 0x195   :  { %v271_v14 = vpop.permute.xlu2 %270 }
 0x196   :  { %v272_v22 = vmul.f32 %v790_v18, %v271_v14 }
 0x1a5   :  { %v260_v7 = vpop.permute.xlu0 %259 }
 0x1a6   :  { %v261_v10 = vmul.f32 %v775_v15, %v260_v7 }
 0x1a8   :  { %v265_v20 = vadd.f32 %v264_v13, %v261_v10 }
 0x1a9   :  { %v212_v42 = vpop.xlane.xlu1 %211 }
 0x1aa   :  { %v214_v44 = vmul.f32 20.0, %v212_v42 }
 0x1ac   :  { %v237_v61 = vrot.slane %v214_v44, 6 }
 0x1ad   :  { %v267_v19 = vpop.permute.xlu0 %266 }
 0x1ae   :  { %v268_v21 = vmul.f32 %v785_v17, %v267_v19 }
 0x1b0   :  { %v269_v23 = vadd.f32 %v268_v21, %v265_v20 }
 0x1b2   :  { %v273_v24 = vadd.f32 %v272_v22, %v269_v23 }
 0x1b4   :  { %v274_v25 = vadd.f32 %v273_v24, %v768_v12 }
 0x1b6   :  { %v275_v27 = vmul.f32 20.0, %v274_v25 }
 0x1b8   :  { %499 = vtanh.f32 %v275_v27 }
 0x1b9   :  { %501 = vrcp.f32 %v175_v28 }
 0x1be   :  { %v500_v29 = vpop.eup %499 }
 0x1bf   :  { %327 = vrot.lane.b32.xlu2 %v500_v29, %s684_s2  ;;  %338 = vrot.lane.b32.xlu1 %v500_v29, %s687_s14  ;;  %v277_v30 = vmul.f32 %v500_v29, %v801_v33  ;;  %v502_v32 = vpop.eup %501 }
 0x1c0   :  { %v177_v34 = vmul.f32 %v502_v32, %v175_v28  ;;  %vm182_vm9 = vweird.f32 %v502_v32 }
 0x1c1   :  { %v278_v31 = vsel %vm143_vm4, %v277_v30, 0.0  ;;  %vm183_vm11 = vmor %vm181_vm10, %vm182_vm9 }
 0x1c2   :  { %279 = vadd.xlane.f32.xlu0 %v278_v31  ;;  %v178_v35 = vsub.f32 1.0, %v177_v34 }
 0x1c4   :  { %v179_v36 = vmul.f32 %v502_v32, %v178_v35 }
 0x1c6   :  { %v180_v37 = vadd.f32 %v502_v32, %v179_v36 }
 0x1c7   :  { %330 = vrot.lane.b32.xlu2 %v500_v29, %s686_s8 }
 0x1c8   :  { %v184_v40 = vsel %vm183_vm11, %v502_v32, %v180_v37 }
 0x1c9   :  { %v189_v43 = vsel %vm186_vm12, %v188_v41, %v184_v40 }
 0x1ca   :  { %v213_v45 = vmul.f32 -100.0, %v189_v43 }
 0x1cc   :  { %v215_v46 = vadd.f32 %v214_v44, %v213_v45 }
 0x1ce   :  { %v465_v47 = vmul.f32 -1.442695, %v215_v46 }
 0x1cf   :  { %334 = vrot.lane.b32.xlu2 %v500_v29, %s685_s13 }
 0x1d0   :  { %503 = vpow2.f32 %v465_v47 }
 0x1d6   :  { %v504_v48 = vpop.eup %503 }
 0x1d7   :  { %v219_v49 = vadd.f32 1.0, %v504_v48 }
 0x1d9   :  { %505 = vrcp.f32 %v219_v49  ;;  %v231_v55 = vand.u32 2147483648, %v219_v49  ;;  %vm225_vm14 = vweird.f32 %v219_v49  ;;  %v229_v56 = vand.u32 2147483647, %v219_v49 }
 0x1db   :  { %v232_v58 = vor.u32 1.1754944e-38, %v231_v55  ;;  %vm230_vm0 = vcmp.eq.f32.partialorder %v229_v56, 8.507059e+37 }
 0x1df   :  { %v506_v50 = vpop.eup %505 }
 0x1e0   :  { %v221_v51 = vmul.f32 %v506_v50, %v219_v49  ;;  %vm226_vm13 = vweird.f32 %v506_v50 }
 0x1e1   :  { %vm227_vm15 = vmor %vm225_vm14, %vm226_vm13 }
 0x1e2   :  { %v222_v52 = vsub.f32 1.0, %v221_v51 }
 0x1e4   :  { %v223_v53 = vmul.f32 %v506_v50, %v222_v52 }
 0x1e6   :  { %v224_v54 = vadd.f32 %v506_v50, %v223_v53 }
 0x1e8   :  { %v228_v57 = vsel %vm227_vm15, %v506_v50, %v224_v54  ;;  %v688_v54 = vmov 0  }
 0x1e9   :  { %v233_v59 = vsel %vm230_vm0, %v232_v58, %v228_v57  ;;  %483 = vset.pattern.permute.xlu1 %v688_v54  ;;  %482 = vset.pattern.permute.xlu0 %v688_v54 }
 0x1ea   :  { %v235_v60 = vmul.f32 -100.0, %v233_v59 }
 0x1ec   :  { %v239_v62 = vadd.f32 %v237_v61, %v235_v60 }
 0x1ee   :  { %v466_v0 = vmul.f32 -1.442695, %v239_v62 }
 0x1f0   :  { %507 = vpow2.f32 %v466_v0 }
 0x1f6   :  { %v508_v2 = vpop.eup %507 }
 0x1f7   :  { %v243_v3 = vadd.f32 1.0, %v508_v2 }
 0x1f9   :  { %509 = vrcp.f32 %v243_v3  ;;  %vm249_vm2 = vweird.f32 %v243_v3  ;;  %v253_v25 = vand.u32 2147483647, %v243_v3 }
 0x1fb   :  { %vm254_vm5 = vcmp.eq.f32.partialorder %v253_v25, 8.507059e+37 }
 0x1ff   :  { %v510_v9 = vpop.eup %509 }
 0x200   :  { %v245_v19 = vmul.f32 %v510_v9, %v243_v3  ;;  %vm250_vm1 = vweird.f32 %v510_v9 }
 0x201   :  { %vm251_vm3 = vmor %vm249_vm2, %vm250_vm1 }
 0x202   :  { %v246_v22 = vsub.f32 1.0, %v245_v19 }
 0x204   :  { %v247_v23 = vmul.f32 %v510_v9, %v246_v22 }
 0x219   :  { %v328_v63 = vpop.permute.xlu2 %327 }
 0x21a   :  { %v329_v6 = vmul.f32 %v775_v15, %v328_v63  ;;  %v255_v15 = vand.u32 2147483648, %v243_v3 }
 0x21c   :  { %v256_v27 = vor.u32 1.1754944e-38, %v255_v15 }
 0x221   :  { %v331_v1 = vpop.permute.xlu2 %330 }
 0x222   :  { %v332_v5 = vmul.f32 %v780_v16, %v331_v1  ;;  %v248_v16 = vadd.f32 %v510_v9, %v247_v23 }
 0x224   :  { %v333_v8 = vadd.f32 %v332_v5, %v329_v6  ;;  %v252_v26 = vsel %vm251_vm3, %v510_v9, %v248_v16 }
 0x225   :  { %v257_v28 = vsel %vm254_vm5, %v256_v27, %v252_v26 }
 0x226   :  { %v281_v30 = vmul.f32 -100.0, %v257_v28 }
 0x229   :  { %v335_v4 = vpop.permute.xlu2 %334 }
 0x22a   :  { %v336_v7 = vmul.f32 %v785_v17, %v335_v4 }
 0x22c   :  { %v337_v11 = vadd.f32 %v336_v7, %v333_v8 }
 0x231   :  { %v339_v10 = vpop.permute.xlu1 %338 }
 0x232   :  { %v340_v13 = vmul.f32 %v790_v18, %v339_v10 }
 0x234   :  { %v341_v14 = vadd.f32 %v340_v13, %v337_v11 }
 0x236   :  { %v342_v20 = vadd.f32 %v341_v14, %v768_v12  ;;  %v280_v12 = vpop.xlane.xlu0 %279 }
 0x237   :  { %v282_v29 = vmul.f32 20.0, %v280_v12 }
 0x238   :  { %v343_v21 = vmul.f32 20.0, %v342_v20 }
 0x239   :  { %v283_v31 = vadd.f32 %v282_v29, %v281_v30  ;;  %v305_v46 = vrot.slane %v282_v29, 6 }
 0x23a   :  { %511 = vtanh.f32 %v343_v21 }
 0x23b   :  { %v467_v32 = vmul.f32 -1.442695, %v283_v31  ;;  %v397_v31 = vlaneseq }
 0x23d   :  { %513 = vpow2.f32 %v467_v32  ;;  %v398_v32 = vand.u32 127, %v397_v31 }
 0x240   :  { %v512_v24 = vpop.eup %511 }
 0x241   :  { %395 = vst [vmem:[#allocation8] sm:$0x3] %v512_v24  ;;  %v345_v17 = vmul.f32 %v512_v24, %v801_v33 }
 0x242   :  { %396 = vst [vmem:[#allocation9 - $0x2] sm:$0xc] %v512_v24  ;;  %424 = dma.vmem_to_hbm [thread:$0]  %s420_s29, 32, %s422_s27, [#allocation4]  }
 0x243   :  { %v346_v18 = vsel %vm143_vm4, %v345_v17, 0.0  ;;  %v514_v34 = vpop.eup %513  ;;  %435 = dma.vmem_to_hbm [thread:$0]  %s431_s6, 32, %s433_s24, [#allocation10]  }
 0x244   :  { %347 = vadd.xlane.f32.xlu2 %v346_v18  ;;  %v287_v35 = vadd.f32 1.0, %v514_v34 }
 0x246   :  { %515 = vrcp.f32 %v287_v35  ;;  %v299_v40 = vand.u32 2147483648, %v287_v35  ;;  %vm293_vm6 = vweird.f32 %v287_v35  ;;  %v297_v41 = vand.u32 2147483647, %v287_v35 }
 0x248   :  { %v300_v43 = vor.u32 1.1754944e-38, %v299_v40  ;;  %vm298_vm8 = vcmp.eq.f32.partialorder %v297_v41, 8.507059e+37 }
 0x24c   :  { %v516_v33 = vpop.eup %515 }
 0x24d   :  { %v289_v36 = vmul.f32 %v516_v33, %v287_v35  ;;  %vm294_vm4 = vweird.f32 %v516_v33 }
 0x24e   :  { %vm295_vm7 = vmor %vm293_vm6, %vm294_vm4  ;;  %vm400_vm4 = vcmp.eq.s32.totalorder %v398_v32, 1  ;;  %vm399_vm6 = vcmp.eq.s32.totalorder %v398_v32, 0 }
 0x24f   :  { %v290_v37 = vsub.f32 1.0, %v289_v36 }
 0x251   :  { %v291_v38 = vmul.f32 %v516_v33, %v290_v37 }
 0x253   :  { %v292_v39 = vadd.f32 %v516_v33, %v291_v38 }
 0x255   :  { %v296_v42 = vsel %vm295_vm7, %v516_v33, %v292_v39 }
 0x256   :  { %v301_v44 = vsel %vm298_vm8, %v300_v43, %v296_v42 }
 0x257   :  { %v303_v45 = vmul.f32 -100.0, %v301_v44 }
 0x259   :  { %v307_v47 = vadd.f32 %v305_v46, %v303_v45 }
 0x25b   :  { %v468_v48 = vmul.f32 -1.442695, %v307_v47 }
 0x25d   :  { %517 = vpow2.f32 %v468_v48 }
 0x263   :  { %v518_v49 = vpop.eup %517 }
 0x264   :  { %v311_v50 = vadd.f32 1.0, %v518_v49 }
 0x266   :  { %519 = vrcp.f32 %v311_v50  ;;  %v323_v57 = vand.u32 2147483648, %v311_v50  ;;  %vm317_vm10 = vweird.f32 %v311_v50  ;;  %v321_v58 = vand.u32 2147483647, %v311_v50 }
 0x268   :  { %v324_v60 = vor.u32 1.1754944e-38, %v323_v57  ;;  %vm322_vm12 = vcmp.eq.f32.partialorder %v321_v58, 8.507059e+37 }
 0x26c   :  { %v520_v51 = vpop.eup %519 }
 0x26d   :  { %v313_v52 = vmul.f32 %v520_v51, %v311_v50  ;;  %vm318_vm9 = vweird.f32 %v520_v51 }
 0x26e   :  { %vm319_vm11 = vmor %vm317_vm10, %vm318_vm9 }
 0x26f   :  { %v314_v53 = vsub.f32 1.0, %v313_v52 }
 0x271   :  { %v315_v55 = vmul.f32 %v520_v51, %v314_v53 }
 0x273   :  { %v316_v56 = vadd.f32 %v520_v51, %v315_v55 }
 0x275   :  { %v320_v59 = vsel %vm319_vm11, %v520_v51, %v316_v56 }
 0x276   :  { %v325_v61 = vsel %vm322_vm12, %v324_v60, %v320_v59 }
 0x277   :  { %v349_v63 = vmul.f32 -100.0, %v325_v61 }
 0x2b7   :  { %v348_v62 = vpop.xlane.xlu2 %347 }
 0x2b8   :  { %v350_v0 = vmul.f32 20.0, %v348_v62 }
 0x2ba   :  { %v351_v1 = vadd.f32 %v350_v0, %v349_v63  ;;  %v373_v20 = vrot.slane %v350_v0, 6 }
 0x2bc   :  { %v469_v2 = vmul.f32 -1.442695, %v351_v1 }
 0x2be   :  { %521 = vpow2.f32 %v469_v2 }
 0x2c4   :  { %v522_v3 = vpop.eup %521 }
 0x2c5   :  { %v355_v4 = vadd.f32 1.0, %v522_v3 }
 0x2c7   :  { %523 = vrcp.f32 %v355_v4  ;;  %v367_v8 = vand.u32 2147483648, %v355_v4  ;;  %v365_v10 = vand.u32 2147483647, %v355_v4  ;;  %vm361_vm14 = vweird.f32 %v355_v4 }
 0x2c9   :  { %v368_v13 = vor.u32 1.1754944e-38, %v367_v8  ;;  %vm366_vm0 = vcmp.eq.f32.partialorder %v365_v10, 8.507059e+37 }
 0x2cd   :  { %v524_v5 = vpop.eup %523 }
 0x2ce   :  { %v357_v6 = vmul.f32 %v524_v5, %v355_v4  ;;  %vm362_vm13 = vweird.f32 %v524_v5 }
 0x2cf   :  { %vm363_vm15 = vmor %vm361_vm14, %vm362_vm13 }
 0x2d0   :  { %v358_v7 = vsub.f32 1.0, %v357_v6 }
 0x2d2   :  { %v359_v9 = vmul.f32 %v524_v5, %v358_v7 }
 0x2d4   :  { %v360_v11 = vadd.f32 %v524_v5, %v359_v9 }
 0x2d6   :  { %v364_v14 = vsel %vm363_vm15, %v524_v5, %v360_v11 }
 0x2d7   :  { %v369_v19 = vsel %vm366_vm0, %v368_v13, %v364_v14 }
 0x2d8   :  { %409 = vperm.xlu1 %483, %v369_v19   ;;  %v371_v21 = vmul.f32 -100.0, %v369_v19 }
 0x2da   :  { %v375_v22 = vadd.f32 %v373_v20, %v371_v21 }
 0x2dc   :  { %v470_v23 = vmul.f32 -1.442695, %v375_v22 }
 0x2de   :  { %525 = vpow2.f32 %v470_v23 }
 0x2e4   :  { %v526_v24 = vpop.eup %525 }
 0x2e5   :  { %v379_v16 = vadd.f32 1.0, %v526_v24 }
 0x2e7   :  { %527 = vrcp.f32 %v379_v16  ;;  %v391_v18 = vand.u32 2147483648, %v379_v16  ;;  %v389_v12 = vand.u32 2147483647, %v379_v16  ;;  %vm385_vm2 = vweird.f32 %v379_v16 }
 0x2e9   :  { %v392_v28 = vor.u32 1.1754944e-38, %v391_v18  ;;  %vm390_vm5 = vcmp.eq.f32.partialorder %v389_v12, 8.507059e+37 }
 0x2ed   :  { %v528_v15 = vpop.eup %527 }
 0x2ee   :  { %v381_v17 = vmul.f32 %v528_v15, %v379_v16  ;;  %vm386_vm1 = vweird.f32 %v528_v15 }
 0x2ef   :  { %vm387_vm3 = vmor %vm385_vm2, %vm386_vm1 }
 0x2f0   :  { %v382_v25 = vsub.f32 1.0, %v381_v17 }
 0x2f2   :  { %v383_v26 = vmul.f32 %v528_v15, %v382_v25 }
 0x2f4   :  { %v384_v27 = vadd.f32 %v528_v15, %v383_v26 }
 0x2f6   :  { %v388_v29 = vsel %vm387_vm3, %v528_v15, %v384_v27 }
 0x2f7   :  { %v393_v30 = vsel %vm390_vm5, %v392_v28, %v388_v29 }
 0x2f8   :  { %403 = vperm.xlu0 %482, %v393_v30  }
 0x34a   :  { %v410_v35 = vpop.permute.xlu1 %409 }
 0x36a   :  { %v404_v34 = vpop.permute.xlu0 %403 }
 0x36b   :  { %v406_v33 = vsel %vm400_vm4, %v404_v34, 0.0 }
 0x36c   :  { %v412_v36 = vsel %vm399_vm6, %v410_v35, %v406_v33 }
 0x36d   :  { %413 = vst [vmem:[#allocation11 - $0x2] sm:$0xc] %v412_v36 }
 0x36e   :  { %446 = dma.vmem_to_hbm [thread:$0]  %s442_s10, 32, %s444_s0, [#allocation10]  }
 0x36f   :  { %677 = dma.done.wait [#allocation4], 32  }
 0x370   :  { %678 = vsyncadd [#allocation4], 4294967264 }
 0x371   :  { %679 = dma.done.wait [#allocation10], 64  }
 0x372   :  { %680 = vsyncadd [#allocation10], 4294967232 }
 0x373   :  { %459 = vsyncpa [#allocation3], 1 }
 0x374   :  { %460 = vsyncpa [#allocation6], 1 }
 0x375   :  { %461 = vsyncpa [#allocation4], 1 }
 0x376   :  { %462 = vsyncpa [#allocation10], 1 }

</bundles_post_ra>
